<compile_context>
chip_gen: v7x
topology: tpu7x:2x2x1
jax: 0.10.0
libtpu: 0.0.40
codegen_flags: <defaults>
</compile_context>

<pallas_src>
import jax
import jax.numpy as jnp
from jax.experimental import pallas as pl
from jax.experimental.pallas import tpu as pltpu

N_OUT = 4
N_OUT_PAD = 8        # class axis padded 4 -> 8 (tiny, lane-masked store; 16x less than 128)
NEG_BIG = -1e30      # bias for padded logit columns -> exp underflows to exactly 0


def dcd_kernel(x_ref, w1_ref, b1_ref, w23_ref, b23_ref, o_ref):
    # fc1 + relu (f32 MXU accumulation; f32 operands keep results faithful to PyTorch)
    h1 = jnp.dot(x_ref[...], w1_ref[...], preferred_element_type=jnp.float32)
    h1 = jnp.maximum(h1 + b1_ref[...], 0.0)
    # folded fc2 + out (no nonlinearity between them in the module)
    logits = jnp.dot(h1, w23_ref[...], preferred_element_type=jnp.float32) + b23_ref[...]
    # softmax over the (8-wide, padded) class axis; padded columns contribute exactly 0
    m = jnp.max(logits, axis=-1, keepdims=True)
    e = jnp.exp(logits - m)
    o_ref[...] = (e / jnp.sum(e, axis=-1, keepdims=True)).astype(o_ref.dtype)


def prepare_params(params):
    """Fold fc2+out (exact, in f32) and pad the class axis to N_OUT_PAD columns."""
    w1, b1, w2, b2, w3, b3 = params            # weights stored (in, out); biases (1, out)
    n_out = w3.shape[1]
    w23 = (w2 @ w3).astype(jnp.float32)        # (H, n_out)
    b23 = (b2 @ w3 + b3).astype(jnp.float32)   # (1, n_out)
    pad = N_OUT_PAD - n_out
    w23 = jnp.pad(w23, ((0, 0), (0, pad)))
    b23 = jnp.pad(b23, ((0, 0), (0, pad)), constant_values=NEG_BIG)
    return (w1.astype(jnp.float32), b1.astype(jnp.float32), w23, b23)


def _round_up(a, m):
    return ((a + m - 1) // m) * m


def _choose_tile(b8, block_b, min_grid_steps=2):
    """Pick a batch tile: as big as block_b allows, >= min_grid_steps grid steps,
    and (in the common case) an exact divisor of the 8-padded batch so no tile-sized
    batch padding / extra jnp.pad pass over x is needed."""
    cap = max(8, _round_up((b8 + min_grid_steps - 1) // min_grid_steps, 8))
    target = max(8, (min(block_b, cap, b8) // 8) * 8)
    tb = target
    while tb > 8 and b8 % tb:
        tb -= 8                       # b8 is a multiple of 8, so tb=8 always divides it
    if tb * 4 < target:
        # awkward batch size: keep big tiles, pad the batch to the tile instead
        return target, _round_up(b8, target)
    return tb, b8


def dcd_forward(x, prepared, *, n_out=N_OUT, block_b=2048):
    w1, b1, w23, b23 = prepared
    B, D_in = x.shape

    b8 = _round_up(B, 8)
    tb, b_pad = _choose_tile(b8, block_b)

    xp = x
    if b_pad != B:
        xp = jnp.pad(x, ((0, b_pad - B), (0, 0)))  # usually only up to 7 rows

    grid = (b_pad // tb,)
    resident = lambda shape: pl.BlockSpec(shape, lambda i: (0,) * len(shape))

    out = pl.pallas_call(
        dcd_kernel,
        out_shape=jax.ShapeDtypeStruct((b_pad, N_OUT_PAD), jnp.float32),
        grid_spec=pl.GridSpec(
            grid=grid,
            in_specs=[
                pl.BlockSpec((tb, D_in), lambda i: (i, 0)),   # x: streamed per batch tile
                resident(w1.shape),                           # weights/biases: VMEM-resident
                resident(b1.shape),
                resident(w23.shape),
                resident(b23.shape),
            ],
            out_specs=pl.BlockSpec((tb, N_OUT_PAD), lambda i: (i, 0)),
        ),
        compiler_params=pltpu.CompilerParams(
            dimension_semantics=("parallel",),
        ),
    )(xp, w1, b1, w23, b23)

    return out[:B, :n_out]


def init_params(key, D_in=256, H=64, n_out=4):
    # PyTorch nn.Linear default init: U(-1/sqrt(fan_in), 1/sqrt(fan_in))
    k = jax.random.split(key, 6)

    def lin(kw, kb, fan_in, fan_out):
        bound = 1.0 / jnp.sqrt(jnp.float32(fan_in))
        w = jax.random.uniform(kw, (fan_in, fan_out), jnp.float32, -bound, bound)
        b = jax.random.uniform(kb, (1, fan_out), jnp.float32, -bound, bound)
        return w, b

    w1, b1 = lin(k[0], k[1], D_in, H)
    w2, b2 = lin(k[2], k[3], H, H)
    w3, b3 = lin(k[4], k[5], H, n_out)
    return (w1, b1, w2, b2, w3, b3)


def dcd_reference(x, params):
    # Faithful f32 reference of the PyTorch module (unfolded, exact softmax).
    w1, b1, w2, b2, w3, b3 = params
    h1 = jnp.maximum(x @ w1 + b1, 0.0)
    h2 = h1 @ w2 + b2
    logits = h2 @ w3 + b3
    return jax.nn.softmax(logits, axis=1)


if __name__ == "__main__":
    key = jax.random.PRNGKey(0)
    kx, kp = jax.random.split(key)

    B, D_in, H, n_out = 128, 256, 64, 4
    x = jax.random.normal(kx, (B, D_in), jnp.float32)
    params = init_params(kp, D_in=D_in, H=H, n_out=n_out)

    prepared = prepare_params(params)
    out = dcd_forward(x, prepared, n_out=n_out)   # default block_b; tile capped -> 2 grid steps here
    jax.block_until_ready(out)

    ref = dcd_reference(x, params)

    assert out.shape == (B, n_out)
    # all-f32 kernel; only differences are the exact fc2/out fold reassociation and
    # backend matmul rounding, so a few-e-3 tolerance is ample.
    assert jnp.allclose(out, ref, atol=5e-3, rtol=5e-3), "value mismatch vs reference"
    # exact softmax normalization (padded lanes contribute exactly 0)
    assert jnp.allclose(jnp.sum(out, axis=1), 1.0, atol=1e-4), "rows do not sum to 1"
    # class decisions must agree wherever the reference decision is not a near-tie
    top2 = jnp.sort(ref, axis=1)
    clear = (top2[:, -1] - top2[:, -2]) > 2e-2
    agree = jnp.argmax(out, axis=1) == jnp.argmax(ref, axis=1)
    assert bool(jnp.all(jnp.where(clear, agree, True))), "argmax mismatch on confident rows"

    print("KERNEL_OK")
</pallas_src>

<mosaic_0001>
module attributes {stable_mosaic.version = 11 : i64} {
  func.func @dcd_kernel(%arg0: i32, %arg1: memref<64x256xf32, #tpu.memory_space<vmem>>, %arg2: memref<256x64xf32, #tpu.memory_space<vmem>>, %arg3: memref<1x64xf32, #tpu.memory_space<vmem>>, %arg4: memref<64x8xf32, #tpu.memory_space<vmem>>, %arg5: memref<1x8xf32, #tpu.memory_space<vmem>>, %arg6: memref<64x8xf32, #tpu.memory_space<vmem>>) attributes {dimension_semantics = [#tpu.dimension_semantics<parallel>], iteration_bounds = array<i64: 2>, scalar_prefetch = 0 : i64, scratch_operands = 0 : i64, tpu.core_type = #tpu.core_type<tc>, window_params = [{transform_indices = @transform_0, window_bounds = array<i64: 64, 256>}, {pipeline_mode = #tpu.pipeline_mode<synchronous>, transform_indices = @transform_1, window_bounds = array<i64: 256, 64>}, {pipeline_mode = #tpu.pipeline_mode<synchronous>, transform_indices = @transform_2, window_bounds = array<i64: 1, 64>}, {pipeline_mode = #tpu.pipeline_mode<synchronous>, transform_indices = @transform_3, window_bounds = array<i64: 64, 8>}, {pipeline_mode = #tpu.pipeline_mode<synchronous>, transform_indices = @transform_4, window_bounds = array<i64: 1, 8>}, {transform_indices = @transform_5, window_bounds = array<i64: 64, 8>}]} {
    %c0 = arith.constant 0 : index
    %c0_0 = arith.constant 0 : index
    %0 = vector.load %arg1[%c0, %c0_0] : memref<64x256xf32, #tpu.memory_space<vmem>>, vector<64x256xf32>
    %c0_1 = arith.constant 0 : index
    %c0_2 = arith.constant 0 : index
    %1 = vector.load %arg2[%c0_1, %c0_2] : memref<256x64xf32, #tpu.memory_space<vmem>>, vector<256x64xf32>
    %cst = arith.constant dense<0.000000e+00> : vector<64x64xf32>
    %2 = tpu.matmul %0, %1, %cst {dimension_numbers = #tpu.dot_dimension_numbers<[1], [0], [0], [1], [0, 0, 1, 1], [], []>} : vector<64x256xf32>, vector<256x64xf32>, vector<64x64xf32> -> vector<64x64xf32>
    %c0_3 = arith.constant 0 : index
    %c0_4 = arith.constant 0 : index
    %3 = vector.load %arg3[%c0_3, %c0_4] : memref<1x64xf32, #tpu.memory_space<vmem>>, vector<1x64xf32>
    %4 = vector.broadcast %3 : vector<1x64xf32> to vector<64x64xf32>
    %5 = arith.addf %2, %4 : vector<64x64xf32>
    %cst_5 = arith.constant 0.000000e+00 : f32
    %6 = vector.broadcast %cst_5 : f32 to vector<64x64xf32>
    %7 = arith.maximumf %5, %6 : vector<64x64xf32>
    %c0_6 = arith.constant 0 : index
    %c0_7 = arith.constant 0 : index
    %8 = vector.load %arg4[%c0_6, %c0_7] : memref<64x8xf32, #tpu.memory_space<vmem>>, vector<64x8xf32>
    %cst_8 = arith.constant dense<0.000000e+00> : vector<64x8xf32>
    %9 = tpu.matmul %7, %8, %cst_8 {dimension_numbers = #tpu.dot_dimension_numbers<[1], [0], [0], [1], [0, 0, 1, 1], [], []>} : vector<64x64xf32>, vector<64x8xf32>, vector<64x8xf32> -> vector<64x8xf32>
    %c0_9 = arith.constant 0 : index
    %c0_10 = arith.constant 0 : index
    %10 = vector.load %arg5[%c0_9, %c0_10] : memref<1x8xf32, #tpu.memory_space<vmem>>, vector<1x8xf32>
    %11 = vector.broadcast %10 : vector<1x8xf32> to vector<64x8xf32>
    %12 = arith.addf %9, %11 : vector<64x8xf32>
    %cst_11 = arith.constant dense<0xFF800000> : vector<64xf32>
    %13 = vector.multi_reduction <maximumf>, %12, %cst_11 [1] : vector<64x8xf32> to vector<64xf32>
    %14 = vector.shape_cast %13 : vector<64xf32> to vector<64x1xf32>
    %15 = vector.broadcast %14 : vector<64x1xf32> to vector<64x8xf32>
    %16 = arith.subf %12, %15 : vector<64x8xf32>
    %17 = math.exp %16 : vector<64x8xf32>
    %cst_12 = arith.constant dense<0.000000e+00> : vector<64xf32>
    %18 = vector.multi_reduction <add>, %17, %cst_12 [1] : vector<64x8xf32> to vector<64xf32>
    %19 = vector.shape_cast %18 : vector<64xf32> to vector<64x1xf32>
    %20 = vector.broadcast %19 : vector<64x1xf32> to vector<64x8xf32>
    %21 = arith.divf %17, %20 : vector<64x8xf32>
    %c0_13 = arith.constant 0 : index
    %c0_14 = arith.constant 0 : index
    %22 = vector.load %arg6[%c0_13, %c0_14] : memref<64x8xf32, #tpu.memory_space<vmem>>, vector<64x8xf32>
    tpu.vector_store %arg6[%c0_13, %c0_14], %21 {strides = array<i32>} : memref<64x8xf32, #tpu.memory_space<vmem>>, vector<64x8xf32>,
    return
  }
  func.func @transform_0(%arg0: i32) -> (i32, i32) {
    %c0_i32 = arith.constant 0 : i32
    %c0_i32_0 = arith.constant 0 : i32
    return %arg0, %c0_i32 : i32, i32
  }
  func.func @transform_1(%arg0: i32) -> (i32, i32) {
    %c0_i32 = arith.constant 0 : i32
    %c0_i32_0 = arith.constant 0 : i32
    %c0_i32_1 = arith.constant 0 : i32
    return %c0_i32, %c0_i32_0 : i32, i32
  }
  func.func @transform_2(%arg0: i32) -> (i32, i32) {
    %c0_i32 = arith.constant 0 : i32
    %c0_i32_0 = arith.constant 0 : i32
    %c0_i32_1 = arith.constant 0 : i32
    return %c0_i32, %c0_i32_0 : i32, i32
  }
  func.func @transform_3(%arg0: i32) -> (i32, i32) {
    %c0_i32 = arith.constant 0 : i32
    %c0_i32_0 = arith.constant 0 : i32
    %c0_i32_1 = arith.constant 0 : i32
    return %c0_i32, %c0_i32_0 : i32, i32
  }
  func.func @transform_4(%arg0: i32) -> (i32, i32) {
    %c0_i32 = arith.constant 0 : i32
    %c0_i32_0 = arith.constant 0 : i32
    %c0_i32_1 = arith.constant 0 : i32
    return %c0_i32, %c0_i32_0 : i32, i32
  }
  func.func @transform_5(%arg0: i32) -> (i32, i32) {
    %c0_i32 = arith.constant 0 : i32
    %c0_i32_0 = arith.constant 0 : i32
    return %arg0, %c0_i32 : i32, i32
  }
}

</mosaic_0001>

<bundles_post_ra>
// kernel: tpu_custom_call.1
= control target key start
LH: loop header
LB: loop body
LE: loop exit
PB: predicated region body
PF: predicated region fallthrough
CT: control target
= control target key end

     0   :  { %s946_s18 = smov 0   ;;  %s1153_s0 = inlined_call_operand.vmem [shape: f32[128,256], index: 0, kind: input, shape index: {}]   ;;  %s1154_s1 = inlined_call_operand.vmem [shape: f32[256,64], index: 1, kind: input, shape index: {}]   ;;  %s1155_s2 = inlined_call_operand.vmem [shape: f32[1,64], index: 2, kind: input, shape index: {}]   ;;  %s1156_s3 = inlined_call_operand.vmem [shape: f32[64,8], index: 3, kind: input, shape index: {}]   ;;  %s1157_s4 = inlined_call_operand.vmem [shape: f32[1,8], index: 4, kind: input, shape index: {}]   ;;  %s1158_s5 = inlined_call_operand.vmem [shape: f32[128,8], index: 5, kind: output, shape index: {}]  }
   0x1 LB: > { %s697_s19 = sadd.s32 4294967295, %s914_s18   ;;  %p701_p0 = scmp.ge.s32.totalorder %s914_s18, 1  ;;  %s914_s18 = sphi %s946_s18, %s15_s18  }
   0x2   : > { %p189_p1 = scmp.lt.s32.totalorder %s914_s18, 3 }
   0x4   : > { %p190_p2 = pnand %p701_p0, %p189_p1 }
   0x5   : > { %v263_v0 = vld [vmem:[%s1154_s1 + $0x80] sm:$0xff] (!%p190_p2)  ;;  %v264_v1 = vld [vmem:[%s1154_s1 + $0x88] sm:$0xff] (!%p190_p2)  ;;  %s702_s26 = sshll.u32 (!%p190_p2), %s697_s19, 3  ;;  %v265_v5 = vld [vmem:[%s1154_s1 + $0x90] sm:$0xff] (!%p190_p2)  ;;  %vm414_vm0 = vcmask (!%p190_p2), 523264   ;;  %vm544_vm1 = vcmask (!%p190_p2), 64512  }
   0x6   : > { %193 = sbr.rel (%p190_p2) target bundleno = 817 (0x331), region = 40  ;;  %v247_v2 = vld [vmem:[%s1154_s1] sm:$0xff] (!%p190_p2)  ;;  %v820_v3 = vpack.c.bf16 (!%p190_p2), %v264_v1, %v263_v0  ;;  %v248_v4 = vld [vmem:[%s1154_s1 + $0x8] sm:$0xff] (!%p190_p2)  ;;  %v266_v6 = vld [vmem:[%s1154_s1 + $0x98] sm:$0xff] (!%p190_p2)  ;;  %p219_p3 = scmp.lt.s32.totalorder (!%p190_p2), %s702_s26, 15 }
   0x7   : > { %v822_v7 = vpack.c.bf16 (!%p190_p2), %v248_v4, %v247_v2  ;;  %v824_v8 = vpack.c.bf16 (!%p190_p2), %v266_v6, %v265_v5  ;;  %v249_v9 = vld [vmem:[%s1154_s1 + $0x10] sm:$0xff] (!%p190_p2)  ;;  %v250_v10 = vld [vmem:[%s1154_s1 + $0x18] sm:$0xff] (!%p190_p2)  ;;  %v267_v11 = vld [vmem:[%s1154_s1 + $0xa0] sm:$0xff] (!%p190_p2) }
   0x8   : > { %821 = vmatprep.subr.bf16.mxu0 (!%p190_p2), %v820_v3  ;;  %v268_v12 = vld [vmem:[%s1154_s1 + $0xa8] sm:$0xff] (!%p190_p2)  ;;  %v826_v13 = vpack.c.bf16 (!%p190_p2), %v250_v10, %v249_v9  ;;  %v251_v15 = vld [vmem:[%s1154_s1 + $0x20] sm:$0xff] (!%p190_p2)  ;;  %v269_v17 = vld [vmem:[%s1154_s1 + $0xb0] sm:$0xff] (!%p190_p2) }
   0x9   : > { %823 = vmatpush3.bf16.msra.mxu0 (!%p190_p2), %v822_v7  ;;  %v828_v14 = vpack.c.bf16 (!%p190_p2), %v268_v12, %v267_v11  ;;  %v252_v16 = vld [vmem:[%s1154_s1 + $0x28] sm:$0xff] (!%p190_p2)  ;;  %v270_v18 = vld [vmem:[%s1154_s1 + $0xb8] sm:$0xff] (!%p190_p2)  ;;  %v253_v21 = vld [vmem:[%s1154_s1 + $0x30] sm:$0xff] (!%p190_p2) }
   0xa   : > { %825 = vmatprep.subr.bf16.mxu0 (!%p190_p2), %v824_v8  ;;  %v830_v19 = vpack.c.bf16 (!%p190_p2), %v252_v16, %v251_v15  ;;  %v832_v20 = vpack.c.bf16 (!%p190_p2), %v270_v18, %v269_v17  ;;  %v254_v22 = vld [vmem:[%s1154_s1 + $0x38] sm:$0xff] (!%p190_p2)  ;;  %v271_v23 = vld [vmem:[%s1154_s1 + $0xc0] sm:$0xff] (!%p190_p2)  ;;  %v272_v24 = vld [vmem:[%s1154_s1 + $0xc8] sm:$0xff] (!%p190_p2) }
   0xb   : > { %v834_v26 = vpack.c.bf16 (!%p190_p2), %v254_v22, %v253_v21  ;;  %v836_v27 = vpack.c.bf16 (!%p190_p2), %v272_v24, %v271_v23  ;;  %v255_v28 = vld [vmem:[%s1154_s1 + $0x40] sm:$0xff] (!%p190_p2)  ;;  %v256_v29 = vld [vmem:[%s1154_s1 + $0x48] sm:$0xff] (!%p190_p2)  ;;  %v273_v30 = vld [vmem:[%s1154_s1 + $0xd0] sm:$0xff] (!%p190_p2) }
   0xc   : > { %v274_v31 = vld [vmem:[%s1154_s1 + $0xd8] sm:$0xff] (!%p190_p2)  ;;  %v838_v32 = vpack.c.bf16 (!%p190_p2), %v256_v29, %v255_v28  ;;  %v399_v33 = vld [vmem:[%s1156_s3] sm:$0xff] (!%p190_p2)  ;;  %v400_v34 = vld [vmem:[%s1156_s3 + $0x8] sm:$0xff] (!%p190_p2) }
   0xd   : > { %s1160_s26 = smov (!%p219_p3, %s702_s26), 15  ;;  %827 = vmatpush3.bf16.msra.mxu0 %v826_v13  ;;  %v840_v35 = vpack.c.bf16 %v274_v31, %v273_v30  ;;  %v257_v36 = vld [vmem:[%s1154_s1 + $0x50] sm:$0xff]  ;;  %v258_v37 = vld [vmem:[%s1154_s1 + $0x58] sm:$0xff]  ;;  %v852_v38 = vpack.c.bf16 %v400_v34, %v399_v33  ;;  %v275_v39 = vld [vmem:[%s1154_s1 + $0xe0] sm:$0xff] }
   0xe   : > { %s719_s21 = sshll.u32 %s1160_s26, 4  ;;  %829 = vmatprep.subr.bf16.mxu0 %v828_v14  ;;  %v276_v40 = vld [vmem:[%s1154_s1 + $0xe8] sm:$0xff]  ;;  %v842_v41 = vpack.c.bf16 %v258_v37, %v257_v36  ;;  %v259_v43 = vld [vmem:[%s1154_s1 + $0x60] sm:$0xff]  ;;  %v277_v45 = vld [vmem:[%s1154_s1 + $0xf0] sm:$0xff]  ;;  %s706_s16 = sshll.u32 %s1160_s26, 3 }
   0xf   : > { %s1002_s29 = scalar_lea.vmem %s1153_s0, %s719_s21  ;;  %853 = vmatprep.subr.bf16.mxu1 %v852_v38  ;;  %v844_v42 = vpack.c.bf16 %v276_v40, %v275_v39  ;;  %v260_v44 = vld [vmem:[%s1154_s1 + $0x68] sm:$0xff]  ;;  %v278_v46 = vld [vmem:[%s1154_s1 + $0xf8] sm:$0xff]  ;;  %v261_v49 = vld [vmem:[%s1154_s1 + $0x70] sm:$0xff]  ;;  %s1132_s20 = scalar_lea.vmem %s1158_s5, %s706_s16 }
  0x10   : > { %v232_v25 = vld [vmem:[%s1002_s29 + $0x8] sm:$0xff]  ;;  %855 = vmatpush3.bf16.msra.mxu1 %v852_v38  ;;  %v846_v47 = vpack.c.bf16 %v260_v44, %v259_v43  ;;  %v848_v48 = vpack.c.bf16 %v278_v46, %v277_v45  ;;  %v262_v50 = vld [vmem:[%s1154_s1 + $0x78] sm:$0xff]  ;;  %v231_v52 = vld [vmem:[%s1002_s29] sm:$0xff] }
  0x11   : > { %350 = vmatprep.mubr.f32.mxu0 %v232_v25  ;;  %831 = vmatpush3.bf16.msra.mxu0 %v830_v19  ;;  %v850_v51 = vpack.c.bf16 %v262_v50, %v261_v49  ;;  %v234_v53 = vld [vmem:[%s1002_s29 + $0x18] sm:$0xff]  ;;  %v233_v54 = vld [vmem:[%s1002_s29 + $0x10] sm:$0xff]  ;;  %v236_v55 = vld [vmem:[%s1002_s29 + $0x28] sm:$0xff] }
  0x12   : > { %833 = vmatprep.subr.bf16.mxu0 %v832_v20  ;;  %v235_v56 = vld [vmem:[%s1002_s29 + $0x20] sm:$0xff]  ;;  %v238_v57 = vld [vmem:[%s1002_s29 + $0x38] sm:$0xff]  ;;  %v237_v58 = vld [vmem:[%s1002_s29 + $0x30] sm:$0xff] }
  0x13   : > { %v240_v59 = vld [vmem:[%s1002_s29 + $0x48] sm:$0xff]  ;;  %v239_v60 = vld [vmem:[%s1002_s29 + $0x40] sm:$0xff]  ;;  %v242_v61 = vld [vmem:[%s1002_s29 + $0x58] sm:$0xff] }
  0x14   : > { %v241_v62 = vld [vmem:[%s1002_s29 + $0x50] sm:$0xff]  ;;  %v244_v63 = vld [vmem:[%s1002_s29 + $0x68] sm:$0xff]  ;;  %v243_v0 = vld [vmem:[%s1002_s29 + $0x60] sm:$0xff] }
  0x15   : > { %835 = vmatpush3.bf16.msra.mxu0 %v834_v26  ;;  %v246_v1 = vld [vmem:[%s1002_s29 + $0x78] sm:$0xff]  ;;  %v245_v2 = vld [vmem:[%s1002_s29 + $0x70] sm:$0xff]  ;;  %v403_v6 = vld [vmem:[%s1156_s3 + $0x20] sm:$0xff] }
  0x16   : > { %837 = vmatprep.subr.bf16.mxu0 %v836_v27  ;;  %v401_v3 = vld [vmem:[%s1156_s3 + $0x10] sm:$0xff]  ;;  %v402_v4 = vld [vmem:[%s1156_s3 + $0x18] sm:$0xff]  ;;  %v404_v7 = vld [vmem:[%s1156_s3 + $0x28] sm:$0xff] }
  0x17   : > { %v856_v5 = vpack.c.bf16 %v402_v4, %v401_v3  ;;  %v860_v8 = vpack.c.bf16 %v404_v7, %v403_v6  ;;  %v405_v9 = vld [vmem:[%s1156_s3 + $0x30] sm:$0xff]  ;;  %v406_v10 = vld [vmem:[%s1156_s3 + $0x38] sm:$0xff]  ;;  %v707_v14 = vld [vmem:[%s1155_s2] ss:$0 sm:$0xff] }
  0x18   : > { %v864_v11 = vpack.c.bf16 %v406_v10, %v405_v9 }
  0x19   : > { %839 = vmatpush3.bf16.msra.mxu0 %v838_v32  ;;  %857 = vmatprep.subr.bf16.mxu1 %v856_v5 }
  0x1a   : > { %841 = vmatprep.subr.bf16.mxu0 %v840_v35  ;;  %859 = vmatpush3.bf16.msra.mxu1 %v856_v5 }
  0x1b   : > { %861 = vmatprep.subr.bf16.mxu1 %v860_v8 }
  0x1d   : > { %843 = vmatpush3.bf16.msra.mxu0 %v842_v41 }
  0x1e   : > { %845 = vmatprep.subr.bf16.mxu0 %v844_v42  ;;  %863 = vmatpush3.bf16.msra.mxu1 %v860_v8 }
  0x1f   : > { %865 = vmatprep.subr.bf16.mxu1 %v864_v11 }
  0x21   : > { %847 = vmatpush3.bf16.msra.mxu0 %v846_v47 }
  0x22   : > { %849 = vmatprep.subr.bf16.mxu0 %v848_v48  ;;  %867 = vmatpush3.bf16.msra.mxu1 %v864_v11 }
  0x25   : > { %851 = vmatpush3.bf16.msra.mxu0 %v850_v51 }
  0x28   : > { %351 = vmatmul.mubr.f32.vlgmr.msra.gmra.mrb[0].mxu0 %v231_v52 }
  0x29   : > { %355 = vmatprep.mubr.f32.mxu0 %v234_v53  ;;  %v708_v53 = vld [vmem:[%s1157_s4] ss:$0 sm:$0xff] }
  0x2c   : > { %356 = vmatmul.mubr.f32.gmra.mrb[2].mxu0 %v233_v54 }
  0x2d   : > { %360 = vmatprep.mubr.f32.mxu0 %v236_v55 }
  0x30   : > { %361 = vmatmul.mubr.f32.gmra.mrb[4].mxu0 %v235_v56 }
  0x31   : > { %365 = vmatprep.mubr.f32.mxu0 %v238_v57 }
  0x34   : > { %366 = vmatmul.mubr.f32.gmra.mrb[6].mxu0 %v237_v58 }
  0x35   : > { %370 = vmatprep.mubr.f32.mxu0 %v240_v59 }
  0x38   : > { %371 = vmatmul.mubr.f32.gmra.mrb[8].mxu0 %v239_v60 }
  0x39   : > { %375 = vmatprep.mubr.f32.mxu0 %v242_v61 }
  0x3c   : > { %376 = vmatmul.mubr.f32.gmra.mrb[10].mxu0 %v241_v62 }
  0x3d   : > { %380 = vmatprep.mubr.f32.mxu0 %v244_v63 }
  0x40   : > { %381 = vmatmul.mubr.f32.gmra.mrb[12].mxu0 %v243_v0 }
  0x41   : > { %385 = vmatprep.mubr.f32.mxu0 %v246_v1 }
  0x44   : > { %386 = vmatmul.mubr.f32.gmra.mrb[14].mxu0 %v245_v2 }
  0xfb   : > { %v752_v12 = vpop.f32.mrb[0].mxu0 }
  0xfc   : > { %v753_v13 = vpop.f32.mrb[1].mxu0 }
  0xfd   : > { %v754_v15 = vadd.f32 %v753_v13, %v752_v12 }
  0xff   : > { %v755_v16 = vpop.f32.mrb[2].mxu0  ;;  %v353_v17 = vadd.f32 %v754_v15, %v707_v14 }
 0x100   : > { %v756_v18 = vpop.f32.mrb[3].mxu0 }
 0x101   : > { %v757_v19 = vadd.f32 %v756_v18, %v755_v16  ;;  %v391_v20 = vmax.f32 %v353_v17, 0.0 }
 0x103   : > { %v358_v21 = vadd.f32 %v757_v19, %v707_v14  ;;  %v758_v22 = vpop.f32.mrb[4].mxu0  ;;  %808 = vmatprep.mubr.msk.f32.mxu1 %vm414_vm0, %v391_v20 }
 0x104   : > { %v759_v23 = vpop.f32.mrb[5].mxu0 }
 0x105   : > { %v392_v24 = vmax.f32 %v358_v21, 0.0  ;;  %v760_v25 = vadd.f32 %v759_v23, %v758_v22 }
 0x107   : > { %v363_v26 = vadd.f32 %v760_v25, %v707_v14  ;;  %v761_v27 = vpop.f32.mrb[6].mxu0  ;;  %809 = vmatmul.mubr.msk.f32.vlgmr.msra.gmra.mrb[0].mxu1 %vm414_vm0, %v392_v24 }
 0x108   : > { %v762_v28 = vpop.f32.mrb[7].mxu0 }
 0x109   : > { %v393_v29 = vmax.f32 %v363_v26, 0.0  ;;  %v763_v30 = vadd.f32 %v762_v28, %v761_v27 }
 0x10b   : > { %v368_v31 = vadd.f32 %v763_v30, %v707_v14  ;;  %v764_v32 = vpop.f32.mrb[8].mxu0  ;;  %811 = vmatprep.mubr.msk.f32.mxu1 %vm414_vm0, %v393_v29 }
 0x10c   : > { %v765_v33 = vpop.f32.mrb[9].mxu0 }
 0x10d   : > { %v394_v34 = vmax.f32 %v368_v31, 0.0  ;;  %v766_v35 = vadd.f32 %v765_v33, %v764_v32 }
 0x10f   : > { %v373_v36 = vadd.f32 %v766_v35, %v707_v14  ;;  %v767_v37 = vpop.f32.mrb[10].mxu0  ;;  %812 = vmatmul.mubr.msk.f32.gmra.mrb[2].mxu1 %vm414_vm0, %v394_v34 }
 0x110   : > { %v768_v38 = vpop.f32.mrb[11].mxu0 }
 0x111   : > { %v395_v39 = vmax.f32 %v373_v36, 0.0  ;;  %v769_v40 = vadd.f32 %v768_v38, %v767_v37 }
 0x113   : > { %v378_v41 = vadd.f32 %v769_v40, %v707_v14  ;;  %v770_v42 = vpop.f32.mrb[12].mxu0  ;;  %814 = vmatprep.mubr.msk.f32.mxu1 %vm414_vm0, %v395_v39 }
 0x114   : > { %v771_v43 = vpop.f32.mrb[13].mxu0 }
 0x115   : > { %v396_v44 = vmax.f32 %v378_v41, 0.0  ;;  %v772_v45 = vadd.f32 %v771_v43, %v770_v42 }
 0x117   : > { %v383_v46 = vadd.f32 %v772_v45, %v707_v14  ;;  %v773_v47 = vpop.f32.mrb[14].mxu0  ;;  %815 = vmatmul.mubr.msk.f32.gmra.mrb[4].mxu1 %vm414_vm0, %v396_v44 }
 0x118   : > { %v774_v48 = vpop.f32.mrb[15].mxu0 }
 0x119   : > { %v397_v49 = vmax.f32 %v383_v46, 0.0  ;;  %v775_v50 = vadd.f32 %v774_v48, %v773_v47 }
 0x11b   : > { %v388_v51 = vadd.f32 %v775_v50, %v707_v14  ;;  %817 = vmatprep.mubr.msk.f32.mxu1 %vm414_vm0, %v397_v49 }
 0x11d   : > { %v398_v52 = vmax.f32 %v388_v51, 0.0 }
 0x11f   : > { %818 = vmatmul.mubr.msk.f32.gmra.mrb[6].mxu1 %vm414_vm0, %v398_v52 }
 0x1da   : > { %v810_v54 = vpop.f32.mrb[0].mxu1 }
 0x1db   : > { %v511_v55 = vadd.f32 %v810_v54, %v708_v53  ;;  %v505_v56 = vpop.f32.mrb[1].mxu1 }
 0x1dc   : > { %v506_v57 = vadd.f32 %v708_v53, %v505_v56 }
 0x1dd   : > { %v548_v58 = vsel %vm544_vm1, %v511_v55, -inf }
 0x1de   : > { %549 = vmax.xlane.f32.xlu0 %v548_v58  ;;  %v545_v59 = vsel %vm544_vm1, %v506_v57, -inf }
 0x1e2   : > { %v813_v60 = vpop.f32.mrb[2].mxu1  ;;  %546 = vmax.xlane.f32.xlu0 %v545_v59 }
 0x1e3   : > { %v521_v61 = vadd.f32 %v813_v60, %v708_v53  ;;  %v515_v62 = vpop.f32.mrb[3].mxu1 }
 0x1e4   : > { %v516_v63 = vadd.f32 %v708_v53, %v515_v62 }
 0x1e5   : > { %v554_v0 = vsel %vm544_vm1, %v521_v61, -inf }
 0x1e6   : > { %555 = vmax.xlane.f32.xlu1 %v554_v0  ;;  %v551_v1 = vsel %vm544_vm1, %v516_v63, -inf }
 0x1ea   : > { %v816_v2 = vpop.f32.mrb[4].mxu1  ;;  %552 = vmax.xlane.f32.xlu1 %v551_v1 }
 0x1eb   : > { %v531_v3 = vadd.f32 %v816_v2, %v708_v53  ;;  %v525_v4 = vpop.f32.mrb[5].mxu1 }
 0x1ec   : > { %v526_v5 = vadd.f32 %v708_v53, %v525_v4 }
 0x1ed   : > { %v560_v6 = vsel %vm544_vm1, %v531_v3, -inf }
 0x1ee   : > { %561 = vmax.xlane.f32.xlu1 %v560_v6  ;;  %v557_v7 = vsel %vm544_vm1, %v526_v5, -inf }
 0x1ef   : > { %558 = vmax.xlane.f32.xlu0 %v557_v7 }
 0x1f2   : > { %v819_v8 = vpop.f32.mrb[6].mxu1 }
 0x1f3   : > { %v541_v9 = vadd.f32 %v819_v8, %v708_v53  ;;  %v535_v10 = vpop.f32.mrb[7].mxu1 }
 0x1f4   : > { %v536_v11 = vadd.f32 %v708_v53, %v535_v10 }
 0x1f5   : > { %v566_v12 = vsel %vm544_vm1, %v541_v9, -inf }
 0x1f6   : > { %567 = vmax.xlane.f32.xlu1 %v566_v12  ;;  %v563_v13 = vsel %vm544_vm1, %v536_v11, -inf }
 0x1f7   : > { %564 = vmax.xlane.f32.xlu0 %v563_v13 }
 0x26b   : > { %v550_v14 = vpop.xlane.xlu0 %549 }
 0x26c   : > { %v570_v15 = vsub.f32 %v511_v55, %v550_v14 }
 0x26e   : > { %v579_v16 = vmul.f32 1.442695, %v570_v15 }
 0x26f   : > { %v547_v17 = vpop.xlane.xlu0 %546 }
 0x270   : > { %876 = vpow2.f32 %v579_v16  ;;  %v569_v18 = vsub.f32 %v506_v57, %v547_v17 }
 0x272   : > { %v577_v19 = vmul.f32 1.442695, %v569_v18 }
 0x273   : > { %v556_v20 = vpop.xlane.xlu1 %555 }
 0x274   : > { %878 = vpow2.f32 %v577_v19  ;;  %v572_v21 = vsub.f32 %v521_v61, %v556_v20 }
 0x276   : > { %v583_v22 = vmul.f32 1.442695, %v572_v21 }
 0x277   : > { %v553_v23 = vpop.xlane.xlu1 %552 }
 0x278   : > { %880 = vpow2.f32 %v583_v22  ;;  %v571_v24 = vsub.f32 %v516_v63, %v553_v23 }
 0x27a   : > { %v877_v25 = vpop.eup %876  ;;  %v581_v26 = vmul.f32 1.442695, %v571_v24 }
 0x27b   : > { %v562_v27 = vpop.xlane.xlu1 %561  ;;  %v596_v28 = vsel %vm544_vm1, %v877_v25, 0.0 }
 0x27c   : > { %882 = vpow2.f32 %v581_v26  ;;  %v574_v29 = vsub.f32 %v531_v3, %v562_v27  ;;  %597 = vadd.xlane.f32.xlu1 %v596_v28  ;;  %v559_v30 = vpop.xlane.xlu0 %558 }
 0x27d   : > { %v573_v31 = vsub.f32 %v526_v5, %v559_v30 }
 0x27e   : > { %v879_v32 = vpop.eup %878  ;;  %v587_v33 = vmul.f32 1.442695, %v574_v29 }
 0x27f   : > { %v585_v34 = vmul.f32 1.442695, %v573_v31  ;;  %v593_v35 = vsel %vm544_vm1, %v879_v32, 0.0 }
 0x280   : > { %884 = vpow2.f32 %v587_v33  ;;  %594 = vadd.xlane.f32.xlu0 %v593_v35 }
 0x281   : > { %886 = vpow2.f32 %v585_v34 }
 0x282   : > { %v881_v36 = vpop.eup %880 }
 0x283   : > { %v568_v37 = vpop.xlane.xlu1 %567  ;;  %v602_v38 = vsel %vm544_vm1, %v881_v36, 0.0 }
 0x284   : > { %v576_v39 = vsub.f32 %v541_v9, %v568_v37  ;;  %603 = vadd.xlane.f32.xlu1 %v602_v38  ;;  %v565_v40 = vpop.xlane.xlu0 %564 }
 0x285   : > { %v575_v41 = vsub.f32 %v536_v11, %v565_v40 }
 0x286   : > { %v883_v42 = vpop.eup %882  ;;  %v591_v43 = vmul.f32 1.442695, %v576_v39 }
 0x287   : > { %v589_v44 = vmul.f32 1.442695, %v575_v41  ;;  %v599_v45 = vsel %vm544_vm1, %v883_v42, 0.0 }
 0x288   : > { %888 = vpow2.f32 %v591_v43  ;;  %600 = vadd.xlane.f32.xlu0 %v599_v45 }
 0x289   : > { %890 = vpow2.f32 %v589_v44 }
 0x28a   : > { %v885_v46 = vpop.eup %884 }
 0x28b   : > { %v887_v47 = vpop.eup %886  ;;  %v608_v48 = vsel %vm544_vm1, %v885_v46, 0.0 }
 0x28c   : > { %609 = vadd.xlane.f32.xlu1 %v608_v48  ;;  %v605_v49 = vsel %vm544_vm1, %v887_v47, 0.0 }
 0x28d   : > { %606 = vadd.xlane.f32.xlu0 %v605_v49 }
 0x292   : > { %v889_v50 = vpop.eup %888 }
 0x293   : > { %v891_v51 = vpop.eup %890  ;;  %v614_v52 = vsel %vm544_vm1, %v889_v50, 0.0 }
 0x294   : > { %615 = vadd.xlane.f32.xlu1 %v614_v52  ;;  %v611_v53 = vsel %vm544_vm1, %v891_v51, 0.0 }
 0x295   : > { %612 = vadd.xlane.f32.xlu0 %v611_v53 }
 0x309   : > { %v598_v54 = vpop.xlane.xlu1 %597 }
 0x30a   : > { %892 = vrcp.f32 %v598_v54 }
 0x30d   : > { %v595_v55 = vpop.xlane.xlu0 %594 }
 0x30e   : > { %894 = vrcp.f32 %v595_v55 }
 0x311   : > { %v604_v56 = vpop.xlane.xlu1 %603 }
 0x312   : > { %896 = vrcp.f32 %v604_v56 }
 0x314   : > { %v893_v57 = vpop.eup %892 }
 0x315   : > { %v620_v58 = vmul.f32 %v893_v57, %v877_v25  ;;  %v601_v59 = vpop.xlane.xlu0 %600 }
 0x316   : > { %898 = vrcp.f32 %v601_v59 }
 0x317   : > { %634 = vst.msk [vmem:[%s1132_s20 + $0x8] sm:$0xff] %vm544_vm1, %v620_v58 }
 0x318   : > { %v895_v60 = vpop.eup %894 }
 0x319   : > { %v618_v61 = vmul.f32 %v895_v60, %v879_v32  ;;  %v610_v62 = vpop.xlane.xlu1 %609 }
 0x31a   : > { %900 = vrcp.f32 %v610_v62  ;;  %v607_v63 = vpop.xlane.xlu0 %606 }
 0x31b   : > { %633 = vst.msk [vmem:[%s1132_s20] sm:$0xff] %vm544_vm1, %v618_v61  ;;  %902 = vrcp.f32 %v607_v63 }
 0x31c   : > { %v897_v0 = vpop.eup %896 }
 0x31d   : > { %v624_v1 = vmul.f32 %v897_v0, %v881_v36 }
 0x31f   : > { %636 = vst.msk [vmem:[%s1132_s20 + $0x18] sm:$0xff] %vm544_vm1, %v624_v1 }
 0x320   : > { %v899_v2 = vpop.eup %898 }
 0x321   : > { %v622_v3 = vmul.f32 %v899_v2, %v883_v42  ;;  %v616_v4 = vpop.xlane.xlu1 %615 }
 0x322   : > { %904 = vrcp.f32 %v616_v4  ;;  %v613_v5 = vpop.xlane.xlu0 %612 }
 0x323   : > { %635 = vst.msk [vmem:[%s1132_s20 + $0x10] sm:$0xff] %vm544_vm1, %v622_v3  ;;  %906 = vrcp.f32 %v613_v5 }
 0x324   : > { %v901_v6 = vpop.eup %900 }
 0x325   : > { %v903_v7 = vpop.eup %902  ;;  %v628_v8 = vmul.f32 %v901_v6, %v885_v46 }
 0x326   : > { %v626_v9 = vmul.f32 %v903_v7, %v887_v47 }
 0x327   : > { %638 = vst.msk [vmem:[%s1132_s20 + $0x28] sm:$0xff] %vm544_vm1, %v628_v8 }
 0x328   : > { %637 = vst.msk [vmem:[%s1132_s20 + $0x20] sm:$0xff] %vm544_vm1, %v626_v9 }
 0x32c   : > { %v905_v10 = vpop.eup %904 }
 0x32d   : > { %v907_v11 = vpop.eup %906  ;;  %v632_v12 = vmul.f32 %v905_v10, %v889_v50 }
 0x32e   : > { %v630_v13 = vmul.f32 %v907_v11, %v891_v51 }
 0x32f   : > { %640 = vst.msk [vmem:[%s1132_s20 + $0x38] sm:$0xff] %vm544_vm1, %v632_v12 }
 0x330   : > { %639 = vst.msk [vmem:[%s1132_s20 + $0x30] sm:$0xff] %vm544_vm1, %v630_v13 }
 0x331 PF: > { %s15_s18 = sadd.s32 1, %s914_s18  }
 0x332   : > { %p12_p4 = scmp.ge.s32.totalorder %s15_s18, 4  }
 0x334   :  { %14 = sbr.rel (!%p12_p4) target bundleno = 1 (0x1), region = 70 }

</bundles_post_ra>
